<compile_context>
chip_gen: v6e
topology: v6e:2x2x1
jax: 0.10.0
libtpu: 0.0.40
codegen_flags: <defaults>
</compile_context>

<pallas_src>
import functools
import math

import jax
import jax.numpy as jnp
from jax.experimental import pallas as pl
from jax.experimental.pallas import tpu as pltpu


def _round_up(n, m):
    return ((n + m - 1) // m) * m


def _vmem_limit_bytes():
    # v5e/v6e: 128 MiB VMEM per core, v7x: 64 MiB. Leave headroom; fall back safely.
    try:
        cap = pltpu.get_tpu_info().vmem_capacity_bytes
        return int(min(96 * 2 ** 20, cap * 3 // 4))
    except Exception:
        return 48 * 2 ** 20


# ---------------------------------------------------------------------------
# Fast path: the whole sequence fits in one k tile -> plain softmax, no online
# softmax bookkeeping, fused QKV projection in a single MXU matmul.
# ---------------------------------------------------------------------------
def _attn_single_kernel(x_ref, w_ref, b_ref, o_ref, *, kp, norm_fact, n_valid):
    xt = x_ref[0]                                                     # (Sp, Din) bf16
    # Fused QKV projection: bf16 operands, f32 accumulation, f32 bias add.
    qkv = jnp.dot(xt, w_ref[...], preferred_element_type=jnp.float32) + b_ref[...]
    q = qkv[:, :kp].astype(jnp.bfloat16)                              # (Sp, Kp)
    k = qkv[:, kp:2 * kp].astype(jnp.bfloat16)                        # (Sp, Kp)
    v = qkv[:, 2 * kp:].astype(jnp.bfloat16)                          # (Sp, Vp)

    # q @ k.T without materializing k.T: contract dim 1 of both operands on the MXU.
    s = jax.lax.dot_general(q, k, (((1,), (1,)), ((), ())),
                            preferred_element_type=jnp.float32)       # (Sp, Sp)
    if n_valid is not None:  # mask zero-padded key rows
        key_idx = jax.lax.broadcasted_iota(jnp.int32, s.shape, 1)
        s = jnp.where(key_idx < n_valid, s, -1e30)

    m = jnp.max(s, axis=-1, keepdims=True)
    p = jnp.exp(s - m)
    l = jnp.sum(p, axis=-1, keepdims=True)
    pv = jnp.dot(p.astype(jnp.bfloat16), v, preferred_element_type=jnp.float32)
    # Post-softmax 1/sqrt(dim_k) folded into the (Sp,1) exact reciprocal.
    o_ref[0] = (pv * (norm_fact / l)).astype(o_ref.dtype)


# ---------------------------------------------------------------------------
# General path: flash-style online softmax over k tiles, QKV projection fused
# (Q tile at ki==0, K/V tile every ki step).
# ---------------------------------------------------------------------------
def _attn_flash_kernel(xq_ref, xk_ref, w_ref, b_ref, o_ref,
                       q_sc, m_sc, l_sc, acc_sc,
                       *, kp, norm_fact, n_valid, tk):
    ki = pl.program_id(2)

    @pl.when(ki == 0)
    def _():
        xq = xq_ref[0]                                                # (tq, Din) bf16
        qf = jnp.dot(xq, w_ref[:, :kp],
                     preferred_element_type=jnp.float32) + b_ref[:, :kp]
        q_sc[...] = qf.astype(q_sc.dtype)                             # bf16 Q tile
        m_sc[...] = jnp.full_like(m_sc, -jnp.inf)
        l_sc[...] = jnp.zeros_like(l_sc)
        acc_sc[...] = jnp.zeros_like(acc_sc)

    xk = xk_ref[0]                                                    # (tk, Din) bf16
    kv = jnp.dot(xk, w_ref[:, kp:],
                 preferred_element_type=jnp.float32) + b_ref[:, kp:]  # (tk, Kp+Vp) f32
    k = kv[:, :kp].astype(jnp.bfloat16)
    v = kv[:, kp:].astype(jnp.bfloat16)

    s = jax.lax.dot_general(q_sc[...], k, (((1,), (1,)), ((), ())),
                            preferred_element_type=jnp.float32)       # (tq, tk)
    if n_valid is not None:  # mask zero-padded key rows
        key_idx = ki * tk + jax.lax.broadcasted_iota(jnp.int32, s.shape, 1)
        s = jnp.where(key_idx < n_valid, s, -1e30)

    m_prev = m_sc[...]
    m_new = jnp.maximum(m_prev, jnp.max(s, axis=-1, keepdims=True))
    alpha = jnp.exp(m_prev - m_new)
    p = jnp.exp(s - m_new)
    l_sc[...] = alpha * l_sc[...] + jnp.sum(p, axis=-1, keepdims=True)
    acc_sc[...] = alpha * acc_sc[...] + jnp.dot(p.astype(jnp.bfloat16), v,
                                                preferred_element_type=jnp.float32)
    m_sc[...] = m_new

    @pl.when(ki == pl.num_programs(2) - 1)
    def _():
        # Post-softmax 1/sqrt(dim_k) folded into the (tq,1) exact reciprocal instead
        # of scaling the (tq, tk) score matrix.
        o_ref[0] = (acc_sc[...] * (norm_fact / l_sc[...])).astype(o_ref.dtype)


# ---------------------------------------------------------------------------
# Wrapper
# ---------------------------------------------------------------------------
def self_attention(x, wq, bq, wk, bk, wv, bv, dim_k, *, max_tile=512):
    """x: (B, S, Din); wq/wk: (dim_k, Din); wv: (dim_v, Din); biases 1D."""
    B, S, Din = x.shape
    dim_v = wv.shape[0]
    norm_fact = 1.0 / math.sqrt(dim_k)
    out_dtype = x.dtype
    cdt = jnp.bfloat16                     # MXU operand dtype (f32 accumulation)

    Kp = _round_up(dim_k, 128)             # lane-dense Q/K width
    Vp = _round_up(dim_v, 128)             # lane-dense V / output width
    Dtot = 2 * Kp + Vp

    # Weights pre-transposed to (Din, out) and zero-padded so padded Q/K columns are
    # exactly 0 (do not perturb Q@K^T) and padded V columns give 0 output columns.
    wq_t = jnp.zeros((Din, Kp), cdt).at[:, :dim_k].set(wq.T.astype(cdt))
    wk_t = jnp.zeros((Din, Kp), cdt).at[:, :dim_k].set(wk.T.astype(cdt))
    wv_t = jnp.zeros((Din, Vp), cdt).at[:, :dim_v].set(wv.T.astype(cdt))
    w_all = jnp.concatenate([wq_t, wk_t, wv_t], axis=1)               # (Din, Dtot) bf16

    bq_p = jnp.zeros((Kp,), jnp.float32).at[:dim_k].set(bq.astype(jnp.float32))
    bk_p = jnp.zeros((Kp,), jnp.float32).at[:dim_k].set(bk.astype(jnp.float32))
    bv_p = jnp.zeros((Vp,), jnp.float32).at[:dim_v].set(bv.astype(jnp.float32))
    b_all = jnp.concatenate([bq_p, bk_p, bv_p])[None, :]               # (1, Dtot) f32

    # ---- sequence tiling: pad to a tile multiple, mask padded keys in-kernel ------
    if S <= max_tile:
        tq = tk = _round_up(S, 8)          # single k tile -> fast path
    else:
        tq = tk = max_tile                 # TODO(synk): per-chip sweep 256 vs 512
    Spad = _round_up(S, tk)
    n_valid = S if Spad != S else None

    x_c = x.astype(cdt)
    if Spad != S:
        x_c = jnp.zeros((B, Spad, Din), cdt).at[:, :S, :].set(x_c)

    nq, nk = Spad // tq, Spad // tk

    cparams = lambda sem: pltpu.CompilerParams(
        dimension_semantics=sem, vmem_limit_bytes=_vmem_limit_bytes())

    if nk == 1:
        # -------- single-k-tile fast path --------
        out_padded = pl.pallas_call(
            functools.partial(_attn_single_kernel, kp=Kp, norm_fact=norm_fact,
                              n_valid=n_valid),
            out_shape=jax.ShapeDtypeStruct((B, Spad, Vp), out_dtype),
            grid_spec=pltpu.PrefetchScalarGridSpec(
                num_scalar_prefetch=0,
                grid=(B,),
                in_specs=[
                    pl.BlockSpec((1, Spad, Din), lambda b: (b, 0, 0)),
                    pl.BlockSpec((Din, Dtot), lambda b: (0, 0)),
                    pl.BlockSpec((1, Dtot), lambda b: (0, 0)),
                ],
                out_specs=pl.BlockSpec((1, Spad, Vp), lambda b: (b, 0, 0)),
            ),
            compiler_params=cparams(("parallel",)),
        )(x_c, w_all, b_all)
    else:
        # -------- flash path --------
        out_padded = pl.pallas_call(
            functools.partial(_attn_flash_kernel, kp=Kp, norm_fact=norm_fact,
                              n_valid=n_valid, tk=tk),
            out_shape=jax.ShapeDtypeStruct((B, Spad, Vp), out_dtype),
            grid_spec=pltpu.PrefetchScalarGridSpec(
                num_scalar_prefetch=0,
                grid=(B, nq, nk),
                in_specs=[
                    pl.BlockSpec((1, tq, Din), lambda b, qi, ki: (b, qi, 0)),  # q rows
                    pl.BlockSpec((1, tk, Din), lambda b, qi, ki: (b, ki, 0)),  # k/v rows
                    pl.BlockSpec((Din, Dtot), lambda b, qi, ki: (0, 0)),       # weights
                    pl.BlockSpec((1, Dtot), lambda b, qi, ki: (0, 0)),         # bias
                ],
                out_specs=pl.BlockSpec((1, tq, Vp), lambda b, qi, ki: (b, qi, 0)),
                scratch_shapes=[
                    pltpu.VMEM((tq, Kp), cdt),           # projected Q tile (bf16)
                    pltpu.VMEM((tq, 1), jnp.float32),    # running max
                    pltpu.VMEM((tq, 1), jnp.float32),    # running denom
                    pltpu.VMEM((tq, Vp), jnp.float32),   # output accumulator
                ],
            ),
            compiler_params=cparams(("parallel", "parallel", "arbitrary")),
        )(x_c, x_c, w_all, b_all)

    return out_padded[:, :S, :dim_v]       # drop padded rows / zero-padded V columns


# ---------------------------------------------------------------------------
# Pure-JAX reference mirroring the PyTorch forward (full f32 precision).
# ---------------------------------------------------------------------------
def self_attention_ref(x, wq, bq, wk, bk, wv, bv, dim_k):
    hp = jax.lax.Precision.HIGHEST
    q = jnp.einsum("bsd,kd->bsk", x, wq, precision=hp) + bq
    k = jnp.einsum("bsd,kd->bsk", x, wk, precision=hp) + bk
    v = jnp.einsum("bsd,kd->bsk", x, wv, precision=hp) + bv
    scores = jnp.einsum("bqk,bpk->bqp", q, k, precision=hp)
    atten = jax.nn.softmax(scores, axis=-1) * (1.0 / math.sqrt(dim_k))
    return jnp.einsum("bqp,bpv->bqv", atten, v, precision=hp)


if __name__ == "__main__":
    key = jax.random.PRNGKey(0)
    B, S, input_dim, dim_k, dim_v = 2, 8, 32, 16, 32

    kx, kwq, kbq, kwk, kbk, kwv, kbv, kx2 = jax.random.split(key, 8)
    x = jax.random.normal(kx, (B, S, input_dim), dtype=jnp.float32)

    # PyTorch-style Linear init (uniform, bound 1/sqrt(fan_in))
    bound = 1.0 / math.sqrt(input_dim)
    wq = jax.random.uniform(kwq, (dim_k, input_dim), jnp.float32, -bound, bound)
    bq = jax.random.uniform(kbq, (dim_k,), jnp.float32, -bound, bound)
    wk = jax.random.uniform(kwk, (dim_k, input_dim), jnp.float32, -bound, bound)
    bk = jax.random.uniform(kbk, (dim_k,), jnp.float32, -bound, bound)
    wv = jax.random.uniform(kwv, (dim_v, input_dim), jnp.float32, -bound, bound)
    bv = jax.random.uniform(kbv, (dim_v,), jnp.float32, -bound, bound)

    # bf16 MXU operands with f32 accumulation -> tolerance reflects bf16 rounding.
    TOL = 2e-2

    # Test 1: shipped module shape -> single-k-tile fast path.
    out = self_attention(x, wq, bq, wk, bk, wv, bv, dim_k)
    out = jax.block_until_ready(out)
    ref = self_attention_ref(x, wq, bq, wk, bk, wv, bv, dim_k)
    assert out.shape == (B, S, dim_v)
    assert jnp.allclose(out, ref, atol=TOL, rtol=TOL), "fast-path mismatch vs reference"

    # Test 2: exercise the flash path + sequence padding/masking (tiny tiles forced).
    S2 = 20
    x2 = jax.random.normal(kx2, (B, S2, input_dim), dtype=jnp.float32)
    out2 = self_attention(x2, wq, bq, wk, bk, wv, bv, dim_k, max_tile=8)
    out2 = jax.block_until_ready(out2)
    ref2 = self_attention_ref(x2, wq, bq, wk, bk, wv, bv, dim_k)
    assert out2.shape == (B, S2, dim_v)
    assert jnp.allclose(out2, ref2, atol=TOL, rtol=TOL), "flash-path mismatch vs reference"

    print("KERNEL_OK")
</pallas_src>

<mosaic_0001>
module attributes {stable_mosaic.version = 11 : i64} {
  func.func @_attn_single_kernel(%arg0: i32, %arg1: memref<1x8x32xbf16, #tpu.memory_space<vmem>>, %arg2: memref<32x384xbf16, #tpu.memory_space<vmem>>, %arg3: memref<1x384xf32, #tpu.memory_space<vmem>>, %arg4: memref<1x8x128xf32, #tpu.memory_space<vmem>>) attributes {dimension_semantics = [#tpu.dimension_semantics<parallel>], iteration_bounds = array<i64: 2>, scalar_prefetch = 0 : i64, scratch_operands = 0 : i64, tpu.core_type = #tpu.core_type<tc>, window_params = [{transform_indices = @transform_0, window_bounds = array<i64: 1, 8, 32>}, {pipeline_mode = #tpu.pipeline_mode<synchronous>, transform_indices = @transform_1, window_bounds = array<i64: 32, 384>}, {pipeline_mode = #tpu.pipeline_mode<synchronous>, transform_indices = @transform_2, window_bounds = array<i64: 1, 384>}, {transform_indices = @transform_3, window_bounds = array<i64: 1, 8, 128>}]} {
    %c0 = arith.constant 0 : index
    %c0_0 = arith.constant 0 : index
    %c0_1 = arith.constant 0 : index
    %0 = vector.load %arg1[%c0, %c0_0, %c0_1] : memref<1x8x32xbf16, #tpu.memory_space<vmem>>, vector<1x8x32xbf16>
    %1 = vector.shape_cast %0 : vector<1x8x32xbf16> to vector<8x32xbf16>
    %c0_2 = arith.constant 0 : index
    %c0_3 = arith.constant 0 : index
    %2 = vector.load %arg2[%c0_2, %c0_3] : memref<32x384xbf16, #tpu.memory_space<vmem>>, vector<32x384xbf16>
    %cst = arith.constant dense<0.000000e+00> : vector<8x384xf32>
    %3 = tpu.matmul %1, %2, %cst {dimension_numbers = #tpu.dot_dimension_numbers<[1], [0], [0], [1], [0, 0, 1, 1], [], []>} : vector<8x32xbf16>, vector<32x384xbf16>, vector<8x384xf32> -> vector<8x384xf32>
    %c0_4 = arith.constant 0 : index
    %c0_5 = arith.constant 0 : index
    %4 = vector.load %arg3[%c0_4, %c0_5] : memref<1x384xf32, #tpu.memory_space<vmem>>, vector<1x384xf32>
    %5 = vector.broadcast %4 : vector<1x384xf32> to vector<8x384xf32>
    %6 = arith.addf %3, %5 : vector<8x384xf32>
    %7 = vector.extract_strided_slice %6 {offsets = [0, 0], sizes = [8, 128], strides = [1, 1]} : vector<8x384xf32> to vector<8x128xf32>
    %8 = arith.truncf %7 : vector<8x128xf32> to vector<8x128xbf16>
    %9 = vector.extract_strided_slice %6 {offsets = [0, 128], sizes = [8, 128], strides = [1, 1]} : vector<8x384xf32> to vector<8x128xf32>
    %10 = arith.truncf %9 : vector<8x128xf32> to vector<8x128xbf16>
    %11 = vector.extract_strided_slice %6 {offsets = [0, 256], sizes = [8, 128], strides = [1, 1]} : vector<8x384xf32> to vector<8x128xf32>
    %12 = arith.truncf %11 : vector<8x128xf32> to vector<8x128xbf16>
    %cst_6 = arith.constant dense<0.000000e+00> : vector<8x8xf32>
    %13 = tpu.matmul %8, %10, %cst_6 {dimension_numbers = #tpu.dot_dimension_numbers<[1], [1], [0], [0], [0, 0, 1, 0], [], []>} : vector<8x128xbf16>, vector<8x128xbf16>, vector<8x8xf32> -> vector<8x8xf32>
    %cst_7 = arith.constant dense<0xFF800000> : vector<8xf32>
    %14 = vector.multi_reduction <maximumf>, %13, %cst_7 [1] : vector<8x8xf32> to vector<8xf32>
    %15 = vector.shape_cast %14 : vector<8xf32> to vector<8x1xf32>
    %16 = vector.broadcast %15 : vector<8x1xf32> to vector<8x8xf32>
    %17 = arith.subf %13, %16 : vector<8x8xf32>
    %18 = math.exp %17 : vector<8x8xf32>
    %cst_8 = arith.constant dense<0.000000e+00> : vector<8xf32>
    %19 = vector.multi_reduction <add>, %18, %cst_8 [1] : vector<8x8xf32> to vector<8xf32>
    %20 = vector.shape_cast %19 : vector<8xf32> to vector<8x1xf32>
    %21 = arith.truncf %18 : vector<8x8xf32> to vector<8x8xbf16>
    %cst_9 = arith.constant dense<0.000000e+00> : vector<8x128xf32>
    %22 = tpu.matmul %21, %12, %cst_9 {dimension_numbers = #tpu.dot_dimension_numbers<[1], [0], [0], [1], [0, 0, 1, 1], [], []>} : vector<8x8xbf16>, vector<8x128xbf16>, vector<8x128xf32> -> vector<8x128xf32>
    %cst_10 = arith.constant 2.500000e-01 : f32
    %23 = vector.broadcast %cst_10 : f32 to vector<8x1xf32>
    %24 = arith.divf %23, %20 : vector<8x1xf32>
    %25 = vector.broadcast %24 : vector<8x1xf32> to vector<8x128xf32>
    %26 = arith.mulf %22, %25 : vector<8x128xf32>
    %c0_11 = arith.constant 0 : index
    %c0_12 = arith.constant 0 : index
    %c0_13 = arith.constant 0 : index
    %27 = vector.load %arg4[%c0_11, %c0_12, %c0_13] : memref<1x8x128xf32, #tpu.memory_space<vmem>>, vector<1x8x128xf32>
    %28 = vector.shape_cast %27 : vector<1x8x128xf32> to vector<8x128xf32>
    %29 = vector.shape_cast %26 : vector<8x128xf32> to vector<1x8x128xf32>
    tpu.vector_store %arg4[%c0_11, %c0_12, %c0_13], %29 {strides = array<i32>} : memref<1x8x128xf32, #tpu.memory_space<vmem>>, vector<1x8x128xf32>,
    return
  }
  func.func @transform_0(%arg0: i32) -> (i32, i32, i32) {
    %c0_i32 = arith.constant 0 : i32
    %c0_i32_0 = arith.constant 0 : i32
    %c0_i32_1 = arith.constant 0 : i32
    return %arg0, %c0_i32, %c0_i32_0 : i32, i32, i32
  }
  func.func @transform_1(%arg0: i32) -> (i32, i32) {
    %c0_i32 = arith.constant 0 : i32
    %c0_i32_0 = arith.constant 0 : i32
    %c0_i32_1 = arith.constant 0 : i32
    return %c0_i32, %c0_i32_0 : i32, i32
  }
  func.func @transform_2(%arg0: i32) -> (i32, i32) {
    %c0_i32 = arith.constant 0 : i32
    %c0_i32_0 = arith.constant 0 : i32
    %c0_i32_1 = arith.constant 0 : i32
    return %c0_i32, %c0_i32_0 : i32, i32
  }
  func.func @transform_3(%arg0: i32) -> (i32, i32, i32) {
    %c0_i32 = arith.constant 0 : i32
    %c0_i32_0 = arith.constant 0 : i32
    %c0_i32_1 = arith.constant 0 : i32
    return %arg0, %c0_i32, %c0_i32_0 : i32, i32, i32
  }
}

</mosaic_0001>

<bundles_post_ra>
// kernel: tpu_custom_call.1
= control target key start
LH: loop header
LB: loop body
LE: loop exit
PB: predicated region body
PF: predicated region fallthrough
CT: control target
= control target key end

     0   :  { %8 = vsyncpa [#allocation3], 0  ;;  %s993_s0 = inlined_call_operand.hbm [shape: bf16[2,8,32], index: 0, kind: input, shape index: {}]   ;;  %s994_s1 = inlined_call_operand.hbm [shape: bf16[32,384], index: 1, kind: input, shape index: {}]   ;;  %s995_s2 = inlined_call_operand.vmem [shape: f32[1,384], index: 2, kind: input, shape index: {}]   ;;  %s996_s3 = inlined_call_operand.hbm [shape: f32[2,8,128], index: 3, kind: output, shape index: {}]  }
   0x1   :  { %10 = vsyncpa [#allocation3 + $0x1], 0 }
   0x2   :  { %11 = vsyncpa [#allocation6], 0 }
   0x3   :  { %12 = vsyncpa [#allocation4], 0 }
   0x4   :  { %14 = vsyncpa [#allocation4 + $0x1], 0  ;;  %s820_s12 = smov 0   ;;  %s822_s13 = smov 0  }
   0x5   :  { %s824_s14 = smov 0   ;;  %s826_s15 = smov 0  }
   0x6 LB: > { %s841_s16 = sadd.s32 4294967295, %s790_s15   ;;  %s544_s17 = sadd.s32 4294967294, %s790_s15   ;;  %s790_s15 = sphi %s826_s15, %s1018_s15   ;;  %s786_s14 = sphi %s824_s14, %s1017_s14   ;;  %s782_s13 = sphi %s822_s13, %s1016_s13   ;;  %s778_s12 = sphi %s820_s12, %s1015_s12  }
   0x7   : > { %p40_p0 = scmp.ne.s32.totalorder %s782_s13, %s778_s12  ;;  %p997_p1 = scmp.eq.s32.totalorder %s841_s16, 0 }
   0x8   : > { %p112_p3 = scmp.eq.s32.totalorder %s544_s17, 1  ;;  %p545_p5 = scmp.ge.s32.totalorder %s790_s15, 1 }
   0x9   : > { %p850_p4 = por %p997_p1, %p40_p0  ;;  %p119_p7 = scmp.lt.s32.totalorder %s790_s15, 3 }
   0xa   : > { %p855_p6 = por %p112_p3, %p40_p0  ;;  %s792_s21 = smov [#allocation5]  }
   0xb   : > { %s1001_s18 = scalar_select %p850_p4, 1, 0 }
   0xc   : > { %s1002_s19 = scalar_select %p855_p6, 1, 0 }
   0xd   : > { %p860_p8 = pnand %p545_p5, %p119_p7  ;;  %s131_s22 = sshll.u32 %s792_s21, 4  ;;  %s132_s22 = int_to_ptr.vmem [resolvable:$true] %s131_s22 }
   0xe   : > { %s874_s24 = sadd.s32 1, %s790_s15   ;;  %s27_s25 = sadd.s32 1, %s786_s14 }
   0xf   : > { %s1003_s20 = scalar_select %p860_p8, 1, 0 }
  0x10   : > { %p602_p9 = pneg %p860_p8  ;;  %s24_s26 = ssub.s32 %s790_s15, %s874_s24 }
  0x11   : > { %s679_s27 = scalar_lea.vmem %s132_s22, 768  ;;  %p687_p5 = scmp.lt.s32.totalorder %s132_s22, %s132_s22 }
  0x12   : > { %p869_p11 = pnand %p602_p9, %p997_p1  ;;  %p680_p13 = scmp.ne.s32.totalorder %s132_s22, %s679_s27 }
  0x13   : > { %p688_p7 = scmp.lt.s32.totalorder %s679_s27, %s679_s27 }
  0x14   : > { %p670_p12 = pneg %p869_p11 }
  0x15   : > { %p689_p10 = por %p688_p7, %p687_p5 }
  0x16   : > { %p682_p0 = pnand %p680_p13, %p670_p12 }
  0x18   : > { %p683_p3 = pneg %p682_p0 }
  0x1a   : > { %p690_p2 = pnand %p689_p10, %p683_p3 }
  0x1c   : > { %693 = shalt.err (!%p690_p2)
}
  0x1d   : > { %s793_s28 = smov 192   ;;  %s794_s29 = smov 12  }
  0x1e   : > { %605 = dma.hbm_to_vmem [thread:$0]  (!%p869_p11), %s994_s1, 768, %s132_s22, [#allocation6], %s793_s28, %s793_s28, %s794_s29  }
  0x1f   : > { %p25_p9 = scmp.eq.s32.totalorder %s24_s26, 0  ;;  %p34_p12 = scmp.ne.s32.totalorder %s786_s14, %s782_s13 }
  0x20   : > { %p35_p10 = scmp.eq.s32.totalorder %s790_s15, 0  ;;  %p615_p2 = scmp.lt.s32.totalorder %s790_s15, 2 }
  0x21   : > { %s891_s5 = scalar_select %p25_p9, %s786_s14, %s27_s25  }
  0x22   : > { %p36_p13 = por %p35_p10, %p34_p12  ;;  %p1005_p0 = scmp.eq.s32.totalorder %s841_s16, 1 }
  0x23   : > { %s148_s7 = sand.u32 1, %s786_s14   ;;  %s549_s8 = sshll.u32 %s790_s15, 6 }
  0x24   : > { %p895_p3 = por %p1005_p0, %p34_p12  ;;  %s548_s9 = sshll.u32 %s148_s7, 2 }
  0x25   : > { %s904_s17 = scalar_lea.hbm %s993_s0, %s549_s8  ;;  %s152_s21 = scalar_lea.vmem [#allocation2], %s548_s9 }
  0x26   : > { %s1006_s6 = scalar_select %p895_p3, 1, 0 }
  0x27   : > { %s159_s22 = sshll.u32 %s152_s21, 4  ;;  %p906_p11 = pnand %p615_p2, %p36_p13  ;;  %s160_s22 = int_to_ptr.vmem [resolvable:$true] %s159_s22 }
  0x28   : > { %s149_s25 = scalar_lea.sflag [#allocation3], %s148_s7  ;;  %s694_s26 = scalar_lea.hbm %s904_s17, 64 }
  0x29   : > { %p695_p5 = scmp.ne.s32.totalorder %s904_s17, %s694_s26  ;;  %p696_p7 = pneg %p906_p11 }
  0x2a   : > { %s699_s29 = scalar_lea.hbm %s993_s0, 128  ;;  %p700_p10 = scmp.lt.s32.totalorder %s904_s17, %s993_s0 }
  0x2b   : > { %p697_p9 = pnand %p696_p7, %p695_p5  ;;  %p701_p2 = scmp.lt.s32.totalorder %s699_s29, %s694_s26 }
  0x2d   : > { %p698_p12 = pneg %p697_p9  ;;  %p702_p13 = por %p701_p2, %p700_p10 }
  0x2f   : > { %p703_p0 = pnand %p702_p13, %p698_p12 }
  0x31   : > { %706 = shalt.err (!%p703_p0)
}
  0x32   : > { %s707_s8 = scalar_lea.vmem %s160_s22, 64  ;;  %s795_s7 = smov [#allocation2]  }
  0x33   : > { %p708_p1 = scmp.ne.s32.totalorder %s160_s22, %s707_s8  ;;  %s712_s9 = sshll.u32 %s795_s7, 4  ;;  %s713_s9 = int_to_ptr.vmem [resolvable:$false] %s712_s9 }
  0x34   : > { %s714_s10 = scalar_lea.vmem %s713_s9, 128  ;;  %p715_p5 = scmp.lt.s32.totalorder %s160_s22, %s713_s9 }
  0x35   : > { %p710_p6 = pnand %p708_p1, %p696_p7  ;;  %p716_p9 = scmp.lt.s32.totalorder %s714_s10, %s707_s8 }
  0x37   : > { %p711_p3 = pneg %p710_p6  ;;  %p717_p4 = por %p716_p9, %p715_p5 }
  0x39   : > { %p718_p8 = pnand %p717_p4, %p711_p3 }
  0x3b   : > { %721 = shalt.err (!%p718_p8)
}
  0x3c   : > { %609 = dma.hbm_to_vmem [thread:$0]  (!%p906_p11), %s904_s17, 64, %s160_s22, %s149_s25  }
  0x3d   : > { %p1008_p12 = scmp.ne.s32.totalorder %s1003_s20, 0 }
  0x3e   : > { %s927_s11 = sand.u32 (!%p1008_p12), 1, %s782_s13   ;;  %p1009_p1 = scmp.ne.s32.totalorder (!%p1008_p12), %s1001_s18, 0 }
  0x3f   : > { %168 = sbr.rel (%p1008_p12) target bundleno = 848 (0x350), region = 32  ;;  %s551_s21 = sshll.u32 (!%p1008_p12), %s927_s11, 2 }
  0x40   : > { %s171_s26 = scalar_lea.sflag (!%p1008_p12), [#allocation3], %s927_s11  ;;  %s174_s27 = scalar_lea.vmem (!%p1008_p12), [#allocation2], %s551_s21 }
  0x44   : > { %765 = dma.done.wait (%p1009_p1), %s171_s26, 64  }
  0x45   : > { %767 = vsyncadd (%p1009_p1), %s171_s26, 4294967232  ;;  %p1010_p4 = scmp.eq.s32.totalorder %s841_s16, 0 }
  0x47   : > { %769 = dma.done.wait (%p1010_p4), [#allocation6], 768   ;;  %p1011_p6 = pmov %p1010_p4 }
  0x48   : > { %v796_v0 = vmov 0   ;;  %v656_v1 = vld [vmem:[#allocation5 + $0x1c] ss:$12 sps:$4 sm:$0xff]   ;;  %v658_v2 = vld [vmem:[#allocation5 + $0x18] ss:$12 sps:$4 sm:$0xff]   ;;  %vm260_vm0 = vcmask 261120   ;;  %v213_v9 = vlaneseq }
  0x49   : > { %771 = vsyncadd (%p1011_p6), [#allocation6], 4294966528  ;;  %296 = vmatprep.mubr.bf16.mxu0 %v796_v0  ;;  %276 = vmatprep.subr.bf16.mxu0 %v656_v1  ;;  %v659_v3 = vld [vmem:[#allocation5 + $0x4] ss:$12 sps:$4 sm:$0xff]   ;;  %v661_v4 = vld [vmem:[#allocation5] ss:$12 sps:$4 sm:$0xff]  }
  0x4a   : > { %277 = vmatpush1.bf16.msra.mxu0 %v658_v2  ;;  %v202_v5 = vld [vmem:[%s174_s27] sm:$0xf]  ;;  %v797_v6 = vmov 0.0   ;;  %vm798_vm1 = vmmov 0   ;;  %v662_v7 = vld [vmem:[#allocation5 + $0x20] ss:$12 sps:$4 sm:$0xff]  }
  0x4b   : > { %278 = vmatprep.subr.bf16.mxu0 %v659_v3  ;;  %574 = vmatprep.subr.bf16.mxu1 %v797_v6  ;;  %v663_v8 = vld [vmem:[#allocation5 + $0x8] ss:$12 sps:$4 sm:$0xff]   ;;  %v214_v10 = vshrl.u32 %v213_v9, 7  ;;  %v211_v12 = vld [vmem:[%s995_s2] sm:$0x7]  ;;  %vm388_vm2 = vcmask 64512  }
  0x4c   : > { %578 = vmatprep.mubr.msk.bf16.mxu1 %vm798_vm1, %v797_v6  ;;  %575 = vmatpush3.bf16.msra.mxu1 %v662_v7  ;;  %vm402_vm3 = vcmask 1043456   ;;  %s553_s17 = sshll.u32 %s927_s11, 3  ;;  %s564_s22 = sshll.u32 %s841_s16, 7 }
  0x4d   : > { %576 = vmatprep.subr.bf16.mxu1 %v797_v6  ;;  %v219_v11 = vsub.s32 1, %v214_v10  ;;  %v215_v14 = vsub.s32 0, %v214_v10  ;;  %v223_v29 = vsub.s32 2, %v214_v10  ;;  %s200_s23 = scalar_lea.vmem [#allocation7], %s553_s17  ;;  %s950_s30 = scalar_lea.hbm %s996_s3, %s564_s22 }
  0x4e   : > { %279 = vmatpush1.bf16.msra.mxu0 %v661_v4  ;;  %s464_s25 = sshll.u32 %s200_s23, 4  ;;  %s451_s4 = scalar_lea.sflag [#allocation4], %s927_s11  ;;  %s952_s25 = int_to_ptr.vmem [resolvable:$true] %s464_s25 }
  0x4f   : > { %582 = vmatprep.subr.bf16.mxu0 %v797_v6  ;;  %v220_v13 = vrot.slane %v211_v12, %v219_v11  ;;  %v216_v18 = vrot.slane %v211_v12, %v215_v14  ;;  %v224_v31 = vrot.slane %v211_v12, %v223_v29  ;;  %s722_s16 = scalar_lea.vmem %s952_s25, 128  ;;  %p1012_p3 = scmp.ne.s32.totalorder %s1006_s6, 0 }
  0x50   : > { %577 = vmatpush3.bf16.msra.mxu1 %v663_v8  ;;  %p723_p8 = scmp.ne.s32.totalorder %s952_s25, %s722_s16  ;;  %s799_s8 = smov [#allocation7]  }
  0x51   : > { %560 = vmatmul.mubr.msk.bf16.vlgmr.msra.gmra.mxu0 %vm260_vm0, %v202_v5  ;;  %588 = vmatprep.subr.bf16.mxu1 %v797_v6  ;;  %s726_s7 = sshll.u32 %s799_s8, 4  ;;  %s727_s7 = int_to_ptr.vmem [resolvable:$false] %s726_s7 }
  0x52   : > { %584 = vmatprep.mubr.msk.bf16.mxu0 %vm798_vm1, %v797_v6  ;;  %p724_p11 = pnand %p723_p8, %p1012_p3  ;;  %s728_s9 = scalar_lea.vmem %s727_s7, 256 }
  0x53   : > { %579 = vmatmul.mubr.msk.bf16.vlgmr.msra.gmra.mxu1 %vm260_vm0, %v202_v5  ;;  %p729_p10 = scmp.lt.s32.totalorder %s952_s25, %s727_s7  ;;  %p730_p2 = scmp.lt.s32.totalorder %s728_s9, %s722_s16 }
  0x54   : > { %590 = vmatprep.mubr.msk.bf16.mxu1 %vm798_vm1, %v797_v6  ;;  %p725_p7 = pneg %p724_p11 }
  0x55   : > { %p731_p13 = por %p730_p2, %p729_p10 }
  0x57   : > { %p732_p0 = pnand %p731_p13, %p725_p7 }
 0x111   : > { %v298_v15 = vpop.f32.mrf.mxu0 }
 0x112   : > { %v299_v22 = vadd.f32 %v298_v15, %v216_v18 }
 0x113   : > { %v300_v16 = vpop.f32.mrf.mxu0  ;;  %v339_v30 = vpop.f32.mrf.mxu1 }
 0x114   : > { %v301_v17 = vadd.f32 %v300_v16, %v220_v13  ;;  %v345_v23 = vpack.c.bf16 %v299_v22, %v299_v22  ;;  %v340_v33 = vadd.f32 %v339_v30, %v224_v31 }
 0x115   : > { %v302_v19 = vpop.f32.mrf.mxu0  ;;  %v580_v32 = vpop.f32.mrf.mxu1 }
 0x116   : > { %v346_v20 = vpack.c.bf16 %v301_v17, %v301_v17  ;;  %v347_v35 = vpack.c.bf16 %v340_v33, %v340_v33 }
 0x117   : > { %v303_v21 = vpop.f32.mrf.mxu0  ;;  %v342_v34 = vpop.f32.mrf.mxu1 }
 0x118   : > { %583 = vmatpush3.bf16.xpose.msra.mxu0 %v346_v20  ;;  %v404_v37 = vsel %vm402_vm3, %v347_v35, 0 }
 0x119   : > { %v581_v36 = vpop.f32.mrf.mxu1  ;;  %589 = vmatpush3.bf16.msra.mxu1 %v404_v37 }
 0x11f   : > { %585 = vmatmul.mubr.bf16.vlgmr.msra.gmra.mxu0 %v345_v23 }
 0x1df   : > { %v382_v24 = vpop.f32.mrf.mxu0 }
 0x1e0   : > { %v389_v25 = vsel %vm388_vm2, %v382_v24, -inf }
 0x1e1   : > { %390 = vmax.xlane.f32.xlu0 %v389_v25  ;;  %v586_v26 = vpop.f32.mrf.mxu0 }
 0x1e3   : > { %v385_v27 = vpop.f32.mrf.mxu0 }
 0x1e5   : > { %v587_v28 = vpop.f32.mrf.mxu0 }
 0x26a   : > { %v391_v38 = vpop.xlane.xlu0 %390 }
 0x26b   : > { %v392_v39 = vsub.f32 %v382_v24, %v391_v38 }
 0x26d   : > { %v393_v40 = vmul.f32 1.442695, %v392_v39 }
 0x26f   : > { %664 = vpow2.f32 %v393_v40 }
 0x27c   : > { %v665_v41 = vpop.eup %664 }
 0x27d   : > { %v395_v42 = vsel %vm388_vm2, %v665_v41, 0.0  ;;  %v398_v43 = vpack.c.bf16 %v665_v41, %v665_v41 }
 0x27e   : > { %396 = vadd.xlane.f32.xlu0 %v395_v42 }
 0x27f   : > { %591 = vmatmul.mubr.msk.bf16.vlgmr.msra.gmra.mxu1 %vm388_vm2, %v398_v43 }
 0x307   : > { %v397_v44 = vpop.xlane.xlu0 %396 }
 0x308   : > { %666 = vrcp.f32 %v397_v44 }
 0x315   : > { %v667_v45 = vpop.eup %666 }
 0x316   : > { %v447_v46 = vmul.f32 0.25, %v667_v45 }
 0x33f   : > { %v440_v47 = vpop.f32.mrf.mxu1 }
 0x340   : > { %v448_v48 = vmul.f32 %v447_v46, %v440_v47 }
 0x341   : > { %v592_v49 = vpop.f32.mrf.mxu1 }
 0x342   : > { %449 = vst [vmem:[%s200_s23] sm:$0xff] %v448_v48 }
 0x343   : > { %v443_v50 = vpop.f32.mrf.mxu1 }
 0x344   : > { %735 = shalt.err (!%p732_p0)
}
 0x345   : > { %s736_s10 = scalar_lea.hbm %s950_s30, 128  ;;  %s740_s26 = scalar_lea.hbm %s996_s3, 256 }
 0x346   : > { %p737_p5 = scmp.ne.s32.totalorder %s950_s30, %s736_s10  ;;  %p741_p1 = scmp.lt.s32.totalorder %s950_s30, %s996_s3 }
 0x347   : > { %p742_p4 = scmp.lt.s32.totalorder %s740_s26, %s736_s10 }
 0x348   : > { %p738_p9 = pnand %p737_p5, %p1012_p3 }
 0x349   : > { %p743_p6 = por %p742_p4, %p741_p1 }
 0x34a   : > { %p739_p12 = pneg %p738_p9 }
 0x34c   : > { %p744_p8 = pnand %p743_p6, %p739_p12 }
 0x34e   : > { %747 = shalt.err (!%p744_p8)
}
 0x34f   : > { %600 = dma.vmem_to_hbm [thread:$0]  (%p1012_p3), %s952_s25, 128, %s950_s30, %s451_s4   ;;  %v593_v51 = vpop.f32.mrf.mxu1 }
 0x350 PF: > { %s476_s20 = sand.u32 1, %s778_s12   ;;  %p1013_p11 = scmp.ne.s32.totalorder %s1002_s19, 0 }
 0x351   : > { %p1014_p7 = scmp.ge.s32.totalorder %s790_s15, 2  ;;  %s477_s17 = scalar_lea.sflag [#allocation4], %s476_s20 }
 0x353   : > { %p611_p10 = pnand %p1014_p7, %p1013_p11 }
 0x355   : > { %p612_p2 = pneg %p611_p10 }
 0x357   : > { %773 = dma.done.wait (%p612_p2), %s477_s17, 128  }
 0x358   : > { %775 = vsyncadd (%p612_p2), %s477_s17, 4294967168  ;;  %p17_p13 = scmp.ge.s32.totalorder %s874_s24, 4   ;;  %s1015_s12 = smov %s782_s13 }
 0x359   : > { %s1016_s13 = smov %s786_s14  ;;  %s1017_s14 = smov %s891_s5 }
 0x35a   : > { %s1018_s15 = smov %s874_s24  ;;  %19 = sbr.rel (!%p17_p13) target bundleno = 6 (0x6), region = 81 }
 0x35f   :  { %482 = vsyncpa [#allocation3], 1 }
 0x360   :  { %484 = vsyncpa [#allocation3 + $0x1], 1 }
 0x361   :  { %485 = vsyncpa [#allocation6], 1 }
 0x362   :  { %486 = vsyncpa [#allocation4], 1 }
 0x363   :  { %488 = vsyncpa [#allocation4 + $0x1], 1 }

</bundles_post_ra>
